<compile_context>
chip_gen: v7x
topology: tpu7x:2x2x1
jax: 0.10.0
libtpu: 0.0.40
codegen_flags: <defaults>
</compile_context>

<pallas_src>
import functools

import jax
import jax.numpy as jnp
from jax import lax
from jax.experimental import pallas as pl
from jax.experimental.pallas import tpu as pltpu


def _ln_kernel(x_ref, gamma_ref, beta_ref, o_ref, *, eps, d_hid):
    """Standard path: one original row per VMEM row (d_hid on the lane axis)."""
    x = x_ref[...].astype(jnp.float32)
    mu = jnp.mean(x, axis=-1, keepdims=True)
    diff = x - mu
    # torch.std is unbiased (ddof=1); eps is added to sigma, NOT to the
    # variance inside the sqrt — both kept to match the PyTorch reference.
    # TODO(synk): d_hid == 1 gives NaN in torch.std; here we return beta
    # (inv_nm1 = 1.0) instead of NaN. Degenerate case, documented divergence.
    inv_nm1 = 1.0 / float(d_hid - 1) if d_hid > 1 else 1.0
    var = jnp.sum(diff * diff, axis=-1, keepdims=True) * jnp.float32(inv_nm1)
    # EUP reciprocal + VPU multiply instead of a d_hid-wide vector divide.
    inv = pl.reciprocal(jnp.sqrt(var) + jnp.float32(eps), approx=False)
    # TODO(synk): if a v7x bundle dump shows the vector-extended (XLU) slot
    # saturating, move these row sums to the MXU via jnp.dot(x, ones((d,1))).
    y = diff * inv
    y = y * gamma_ref[...].astype(jnp.float32) + beta_ref[...].astype(jnp.float32)
    o_ref[...] = y.astype(o_ref.dtype)


def _ln_packed_kernel(x_ref, gamma_ref, beta_ref, seg_ref, o_ref, *, eps, d_hid):
    """Lane-dense path for small d_hid: k = 128 // d_hid original rows share one
    128-lane VMEM row. Per-segment sums (broadcast back across each segment)
    are computed on the otherwise-idle MXU with a block-diagonal ones matrix,
    keeping loads/stores full-width and removing XLU reduction pressure."""
    x = x_ref[...].astype(jnp.float32)
    seg = seg_ref[...]  # (W, W) block-diagonal ones, W = k * d_hid
    # Segment sum, already broadcast across each d_hid-lane segment.
    # Precision.HIGHEST keeps full-f32 accuracy on the MXU (multi-pass).
    mu = jnp.dot(x, seg, preferred_element_type=jnp.float32,
                 precision=lax.Precision.HIGHEST) * jnp.float32(1.0 / d_hid)
    diff = x - mu  # two-pass mean/variance: numerically safe
    inv_nm1 = 1.0 / float(d_hid - 1) if d_hid > 1 else 1.0
    var = jnp.dot(diff * diff, seg, preferred_element_type=jnp.float32,
                  precision=lax.Precision.HIGHEST) * jnp.float32(inv_nm1)
    inv = pl.reciprocal(jnp.sqrt(var) + jnp.float32(eps), approx=False)
    y = diff * inv
    y = y * gamma_ref[...].astype(jnp.float32) + beta_ref[...].astype(jnp.float32)
    o_ref[...] = y.astype(o_ref.dtype)


def _vmem_capacity_bytes():
    """Physical VMEM per TensorCore; conservative v7x default if unavailable."""
    try:
        info = pltpu.get_tpu_info()
        cap = getattr(info, "vmem_capacity_bytes", None)
        if cap:
            return int(cap)
    except Exception:
        pass
    return 64 * 1024 * 1024


def _choose_block_rows(rows, lane_width, in_dtype_size, tile_budget_bytes):
    """Largest row block such that double-buffered in+out tiles plus ~3 (4 for
    sub-f32 inputs) tile-sized f32 compute temporaries fit the budget."""
    n_tmp = 3 if in_dtype_size >= 4 else 4
    per_row = lane_width * (4 * in_dtype_size + n_tmp * 4)
    sub = max(8, 32 // in_dtype_size)  # 8 for f32, 16 for bf16, 32 for int8
    block_rows = (tile_budget_bytes // per_row) // sub * sub
    block_rows = max(sub, int(block_rows))
    if block_rows >= rows:
        return rows  # full-extent block is always legal
    return block_rows


def layer_normalization(z, a_2, b_2, eps=0.001, *, block_rows=None):
    """Pallas implementation of the LayerNormalization module forward pass."""
    # PyTorch: `if z.size(1) == 1: return z` — static shape check.
    if z.shape[1] == 1:
        return z

    d_hid = z.shape[-1]
    assert a_2.shape == (d_hid,) and b_2.shape == (d_hid,)
    lead_shape = z.shape[:-1]
    rows = 1
    for s in lead_shape:
        rows *= s

    in_size = jnp.dtype(z.dtype).itemsize

    # Lane-dense packing for small d_hid (requires rows to pack evenly —
    # metadata-only reshape, no HBM copy).
    k = 128 // d_hid if (d_hid < 128 and 128 % d_hid == 0) else 1
    packed = (k > 1) and (rows % k == 0)

    # Generation-aware VMEM sizing: v5e/v6e have 128 MiB physical VMEM, v7x
    # has 64 MiB per TensorCore.
    phys_vmem = _vmem_capacity_bytes()
    if phys_vmem >= 100 * 1024 * 1024:
        vmem_limit = 100 * 1024 * 1024
    else:
        vmem_limit = min(48 * 1024 * 1024, (phys_vmem * 3) // 4)
    tile_budget = int(vmem_limit * 0.85)

    if packed:
        p_rows, width = rows // k, k * d_hid
        x2d = z.reshape(p_rows, width)
        gamma2d = jnp.tile(a_2, k).reshape(1, width)
        beta2d = jnp.tile(b_2, k).reshape(1, width)
        seg_id = jnp.arange(width, dtype=jnp.int32) // d_hid
        seg = (seg_id[:, None] == seg_id[None, :]).astype(jnp.float32)
        tile_budget -= 2 * width * in_size + width * width * 4
        if block_rows is None:
            block_rows = _choose_block_rows(p_rows, width, in_size, tile_budget)
        kernel = functools.partial(_ln_packed_kernel, eps=eps, d_hid=d_hid)
        in_specs = [
            pl.BlockSpec((block_rows, width), lambda i: (i, 0)),
            # Constant block index -> fetched once, not re-DMA'd per step.
            pl.BlockSpec((1, width), lambda i: (0, 0)),
            pl.BlockSpec((1, width), lambda i: (0, 0)),
            pl.BlockSpec((width, width), lambda i: (0, 0)),
        ]
        operands = (x2d, gamma2d, beta2d, seg)
    else:
        p_rows, width = rows, d_hid
        x2d = z.reshape(p_rows, width)
        gamma2d = a_2.reshape(1, width)
        beta2d = b_2.reshape(1, width)
        tile_budget -= 2 * width * in_size
        if block_rows is None:
            block_rows = _choose_block_rows(p_rows, width, in_size, tile_budget)
        kernel = functools.partial(_ln_kernel, eps=eps, d_hid=d_hid)
        in_specs = [
            pl.BlockSpec((block_rows, width), lambda i: (i, 0)),
            pl.BlockSpec((1, width), lambda i: (0, 0)),
            pl.BlockSpec((1, width), lambda i: (0, 0)),
        ]
        operands = (x2d, gamma2d, beta2d)

    out2d = pl.pallas_call(
        kernel,
        out_shape=jax.ShapeDtypeStruct((p_rows, width), z.dtype),
        grid_spec=pltpu.PrefetchScalarGridSpec(
            num_scalar_prefetch=0,
            grid=(pl.cdiv(p_rows, block_rows),),
            in_specs=in_specs,
            out_specs=pl.BlockSpec((block_rows, width), lambda i: (i, 0)),
        ),
        compiler_params=pltpu.CompilerParams(
            # "parallel" -> megacore sharding of independent row blocks.
            # TODO(synk): if an xprof trace on v7x shows one TensorCore idle,
            # switch this axis to pltpu.CORE_PARALLEL (or an explicit core_map
            # split) to guarantee both TCs stream rows.
            dimension_semantics=("parallel",),
            vmem_limit_bytes=int(vmem_limit),
        ),
    )(*operands)

    return out2d.reshape(*lead_shape, d_hid)


def _reference(z, a_2, b_2, eps=0.001):
    if z.shape[1] == 1:
        return z
    z32 = z.astype(jnp.float32)
    mu = jnp.mean(z32, axis=-1, keepdims=True)
    # unbiased std, matching torch.std default
    sigma = jnp.sqrt(
        jnp.sum((z32 - mu) ** 2, axis=-1, keepdims=True) / (z.shape[-1] - 1)
    )
    out = (z32 - mu) / (sigma + eps) * a_2.astype(jnp.float32) + b_2.astype(jnp.float32)
    return out.astype(z.dtype)


if __name__ == "__main__":
    key = jax.random.PRNGKey(0)
    k1, k2 = jax.random.split(key)
    eps = 0.001

    # Test 1: small d_hid (32) -> lane-dense packed path (4 rows / 128 lanes).
    batch, seq, d_hid = 2, 8, 32
    x = jax.random.normal(k1, (batch, seq, d_hid), dtype=jnp.float32)
    a_2 = jnp.ones((d_hid,), dtype=jnp.float32)   # nn.Parameter(torch.ones)
    b_2 = jnp.zeros((d_hid,), dtype=jnp.float32)  # nn.Parameter(torch.zeros)
    out = jax.block_until_ready(layer_normalization(x, a_2, b_2, eps))
    ref = _reference(x, a_2, b_2, eps)
    assert out.shape == x.shape
    assert jnp.allclose(out, ref, atol=1e-5, rtol=1e-5)

    # Test 2: d_hid multiple of 128, rows (=10) not a multiple of the forced
    # block_rows (=8) -> exercises the unpacked path and the ragged
    # (masked partial-store) last block on hardware.
    b2s, s2s, d2 = 2, 5, 256
    x2 = jax.random.normal(k2, (b2s, s2s, d2), dtype=jnp.float32)
    g2 = 1.0 + 0.01 * jnp.arange(d2, dtype=jnp.float32)
    be2 = 0.02 * jnp.arange(d2, dtype=jnp.float32)
    out2 = jax.block_until_ready(
        layer_normalization(x2, g2, be2, eps, block_rows=8))
    ref2 = _reference(x2, g2, be2, eps)
    assert out2.shape == x2.shape
    assert jnp.allclose(out2, ref2, atol=1e-5, rtol=1e-5)

    # Test 3: z.size(1) == 1 early return (static shape check).
    x3 = jax.random.normal(k1, (2, 1, d_hid), dtype=jnp.float32)
    out3 = jax.block_until_ready(layer_normalization(x3, a_2, b_2, eps))
    assert jnp.array_equal(out3, x3)

    print("KERNEL_OK")
</pallas_src>

<mosaic_0001>
module attributes {stable_mosaic.version = 11 : i64} {
  func.func @_ln_packed_kernel(%arg0: i32, %arg1: memref<4x128xf32, #tpu.memory_space<vmem>>, %arg2: memref<1x128xf32, #tpu.memory_space<vmem>>, %arg3: memref<1x128xf32, #tpu.memory_space<vmem>>, %arg4: memref<128x128xf32, #tpu.memory_space<vmem>>, %arg5: memref<4x128xf32, #tpu.memory_space<vmem>>) attributes {dimension_semantics = [#tpu.dimension_semantics<parallel>], iteration_bounds = array<i64: 1>, scalar_prefetch = 0 : i64, scratch_operands = 0 : i64, tpu.core_type = #tpu.core_type<tc>, window_params = [{transform_indices = @transform_0, window_bounds = array<i64: 4, 128>}, {pipeline_mode = #tpu.pipeline_mode<synchronous>, transform_indices = @transform_1, window_bounds = array<i64: 1, 128>}, {pipeline_mode = #tpu.pipeline_mode<synchronous>, transform_indices = @transform_2, window_bounds = array<i64: 1, 128>}, {pipeline_mode = #tpu.pipeline_mode<synchronous>, transform_indices = @transform_3, window_bounds = array<i64: 128, 128>}, {transform_indices = @transform_4, window_bounds = array<i64: 4, 128>}]} {
    %c0 = arith.constant 0 : index
    %c0_0 = arith.constant 0 : index
    %0 = vector.load %arg1[%c0, %c0_0] : memref<4x128xf32, #tpu.memory_space<vmem>>, vector<4x128xf32>
    %c0_1 = arith.constant 0 : index
    %c0_2 = arith.constant 0 : index
    %1 = vector.load %arg4[%c0_1, %c0_2] : memref<128x128xf32, #tpu.memory_space<vmem>>, vector<128x128xf32>
    %cst = arith.constant dense<0.000000e+00> : vector<4x128xf32>
    %2 = tpu.matmul %0, %1, %cst {dimension_numbers = #tpu.dot_dimension_numbers<[1], [0], [0], [1], [0, 0, 1, 1], [], []>, precision = #tpu.contract_precision<fp32>} : vector<4x128xf32>, vector<128x128xf32>, vector<4x128xf32> -> vector<4x128xf32>
    %cst_3 = arith.constant 3.125000e-02 : f32
    %3 = vector.broadcast %cst_3 : f32 to vector<4x128xf32>
    %4 = arith.mulf %2, %3 : vector<4x128xf32>
    %5 = arith.subf %0, %4 : vector<4x128xf32>
    %6 = arith.mulf %5, %5 : vector<4x128xf32>
    %cst_4 = arith.constant dense<0.000000e+00> : vector<4x128xf32>
    %7 = tpu.matmul %6, %1, %cst_4 {dimension_numbers = #tpu.dot_dimension_numbers<[1], [0], [0], [1], [0, 0, 1, 1], [], []>, precision = #tpu.contract_precision<fp32>} : vector<4x128xf32>, vector<128x128xf32>, vector<4x128xf32> -> vector<4x128xf32>
    %cst_5 = arith.constant 0.0322580636 : f32
    %8 = vector.broadcast %cst_5 : f32 to vector<4x128xf32>
    %9 = arith.mulf %7, %8 : vector<4x128xf32>
    %10 = math.sqrt %9 : vector<4x128xf32>
    %cst_6 = arith.constant 1.000000e-03 : f32
    %11 = vector.broadcast %cst_6 : f32 to vector<4x128xf32>
    %12 = arith.addf %10, %11 : vector<4x128xf32>
    %13 = tpu.reciprocal %12 : vector<4x128xf32> -> vector<4x128xf32>
    %14 = arith.mulf %5, %13 : vector<4x128xf32>
    %c0_7 = arith.constant 0 : index
    %c0_8 = arith.constant 0 : index
    %15 = vector.load %arg2[%c0_7, %c0_8] : memref<1x128xf32, #tpu.memory_space<vmem>>, vector<1x128xf32>
    %16 = vector.broadcast %15 : vector<1x128xf32> to vector<4x128xf32>
    %17 = arith.mulf %14, %16 : vector<4x128xf32>
    %c0_9 = arith.constant 0 : index
    %c0_10 = arith.constant 0 : index
    %18 = vector.load %arg3[%c0_9, %c0_10] : memref<1x128xf32, #tpu.memory_space<vmem>>, vector<1x128xf32>
    %19 = vector.broadcast %18 : vector<1x128xf32> to vector<4x128xf32>
    %20 = arith.addf %17, %19 : vector<4x128xf32>
    %c0_11 = arith.constant 0 : index
    %c0_12 = arith.constant 0 : index
    %21 = vector.load %arg5[%c0_11, %c0_12] : memref<4x128xf32, #tpu.memory_space<vmem>>, vector<4x128xf32>
    tpu.vector_store %arg5[%c0_11, %c0_12], %20 {strides = array<i32>} : memref<4x128xf32, #tpu.memory_space<vmem>>, vector<4x128xf32>,
    return
  }
  func.func @transform_0(%arg0: i32) -> (i32, i32) {
    %c0_i32 = arith.constant 0 : i32
    %c0_i32_0 = arith.constant 0 : i32
    return %arg0, %c0_i32 : i32, i32
  }
  func.func @transform_1(%arg0: i32) -> (i32, i32) {
    %c0_i32 = arith.constant 0 : i32
    %c0_i32_0 = arith.constant 0 : i32
    %c0_i32_1 = arith.constant 0 : i32
    return %c0_i32, %c0_i32_0 : i32, i32
  }
  func.func @transform_2(%arg0: i32) -> (i32, i32) {
    %c0_i32 = arith.constant 0 : i32
    %c0_i32_0 = arith.constant 0 : i32
    %c0_i32_1 = arith.constant 0 : i32
    return %c0_i32, %c0_i32_0 : i32, i32
  }
  func.func @transform_3(%arg0: i32) -> (i32, i32) {
    %c0_i32 = arith.constant 0 : i32
    %c0_i32_0 = arith.constant 0 : i32
    %c0_i32_1 = arith.constant 0 : i32
    return %c0_i32, %c0_i32_0 : i32, i32
  }
  func.func @transform_4(%arg0: i32) -> (i32, i32) {
    %c0_i32 = arith.constant 0 : i32
    %c0_i32_0 = arith.constant 0 : i32
    return %arg0, %c0_i32 : i32, i32
  }
}

</mosaic_0001>

<bundles_post_ra>
// kernel: tpu_custom_call.1
= control target key start
LH: loop header
LB: loop body
LE: loop exit
PB: predicated region body
PF: predicated region fallthrough
CT: control target
= control target key end

     0   :  { %9 = vsyncpa [#allocation3], 0  ;;  %s2881_s0 = inlined_call_operand.hbm [shape: f32[4,128], index: 0, kind: input, shape index: {}]   ;;  %s2882_s1 = inlined_call_operand.vmem [shape: f32[1,128], index: 1, kind: input, shape index: {}]   ;;  %s2883_s2 = inlined_call_operand.vmem [shape: f32[1,128], index: 2, kind: input, shape index: {}]   ;;  %s2884_s3 = inlined_call_operand.hbm [shape: f32[128,128], index: 3, kind: input, shape index: {}]   ;;  %s2885_s4 = inlined_call_operand.hbm [shape: f32[4,128], index: 4, kind: output, shape index: {}]  }
   0x1   :  { %10 = vsyncpa [#allocation6], 0 }
   0x2   :  { %11 = vsyncpa [#allocation4], 0  ;;  %s2408_s15 = smov [#allocation2]   ;;  %s2409_s17 = smov [#allocation5]  }
   0x3   :  { %s18_s16 = sshll.u32 %s2408_s15, 4  ;;  %s31_s18 = sshll.u32 %s2409_s17, 4  ;;  %s19_s16 = int_to_ptr.vmem [resolvable:$true] %s18_s16  ;;  %s2441_s18 = int_to_ptr.vmem [resolvable:$true] %s31_s18 }
   0x4   :  { %s2336_s21 = scalar_lea.hbm %s2881_s0, 64 }
   0x5   :  { %p2337_p0 = scmp.ne.s32.totalorder %s2881_s0, %s2336_s21  ;;  %p2340_p1 = scmp.lt.u32.totalorder %s2336_s21, %s2881_s0 }
   0x7   :  { %p2342_p2 = pnand %p2340_p1, %p2337_p0 }
   0x9   :  { %2345 = shalt.err (!%p2342_p2)
}
   0xa   :  { %s2346_s26 = scalar_lea.vmem %s19_s16, 64  ;;  %p2351_p4 = scmp.lt.s32.totalorder %s19_s16, %s19_s16 }
   0xb   :  { %p2347_p3 = scmp.ne.s32.totalorder %s19_s16, %s2346_s26  ;;  %p2352_p5 = scmp.lt.s32.totalorder %s2346_s26, %s2346_s26 }
   0xd   :  { %p2353_p6 = por %p2352_p5, %p2351_p4 }
   0xf   :  { %p2354_p7 = pnand %p2353_p6, %p2347_p3 }
  0x11   :  { %2357 = shalt.err (!%p2354_p7)
}
  0x12   :  { %21 = dma.hbm_to_vmem [thread:$0]  %s2881_s0, 64, %s19_s16, [#allocation3]  }
  0x13   :  { %s2358_s5 = scalar_lea.hbm %s2884_s3, 2048 }
  0x14   :  { %p2359_p8 = scmp.ne.s32.totalorder %s2884_s3, %s2358_s5  ;;  %p2362_p9 = scmp.lt.u32.totalorder %s2358_s5, %s2884_s3 }
  0x16   :  { %p2364_p10 = pnand %p2362_p9, %p2359_p8 }
  0x18   :  { %2367 = shalt.err (!%p2364_p10)
}
  0x19   :  { %s2368_s10 = scalar_lea.vmem %s2441_s18, 2048  ;;  %p2373_p12 = scmp.lt.s32.totalorder %s2441_s18, %s2441_s18 }
  0x1a   :  { %p2369_p11 = scmp.ne.s32.totalorder %s2441_s18, %s2368_s10  ;;  %p2374_p13 = scmp.lt.s32.totalorder %s2368_s10, %s2368_s10 }
  0x1c   :  { %p2375_p0 = por %p2374_p13, %p2373_p12 }
  0x1e   :  { %p2376_p1 = pnand %p2375_p0, %p2369_p11 }
  0x20   :  { %2379 = shalt.err (!%p2376_p1)
}
  0x21   :  { %s2410_s0 = smov 128   ;;  %s2411_s11 = smov 8  }
  0x22   :  { %37 = dma.hbm_to_vmem [thread:$0]  %s2884_s3, 2048, %s2441_s18, [#allocation6], %s2410_s0, %s2410_s0, %s2411_s11  }
  0x23   :  { %2402 = dma.done.wait [#allocation3], 64  }
  0x24   :  { %2403 = vsyncadd [#allocation3], 4294967232 }
  0x25   :  { %2404 = dma.done.wait [#allocation6], 2048  }
  0x26   :  { %2405 = vsyncadd [#allocation6], 4294965248  ;;  %v2412_v0 = vmov 0.0|0.0   ;;  %vm2413_vm0 = vmmov 0   ;;  %v2414_v1 = vmov 0.0   ;;  %v45_v2 = vld [vmem:[#allocation5] sm:$0xff] }
  0x27   :  { %2016 = vmatprep.subr.bf16.mxu0 %v2412_v0  ;;  %1628 = vmatprep.mubr.msk.f32.mxu0 %vm2413_vm0, %v2414_v1  ;;  %v46_v3 = vld [vmem:[#allocation5 + $0x8] sm:$0xff]  ;;  %v47_v4 = vld [vmem:[#allocation5 + $0x10] sm:$0xff]  ;;  %v62_v5 = vand.u32 4294901760, %v45_v2  ;;  %v48_v7 = vld [vmem:[#allocation5 + $0x18] sm:$0xff]  ;;  %s2415_s17 = smov [#allocation7]  }
  0x28   :  { %2160 = vmatprep.subr.bf16.mxu1 %v2412_v0  ;;  %1838 = vmatprep.mubr.msk.f32.mxu1 %vm2413_vm0, %v2414_v1  ;;  %v65_v6 = vand.u32 4294901760, %v46_v3  ;;  %v68_v8 = vand.u32 4294901760, %v47_v4  ;;  %v71_v9 = vand.u32 4294901760, %v48_v7  ;;  %v49_v10 = vld [vmem:[#allocation5 + $0x20] sm:$0xff]  ;;  %v50_v11 = vld [vmem:[#allocation5 + $0x28] sm:$0xff]  ;;  %v51_v16 = vld [vmem:[#allocation5 + $0x30] sm:$0xff] }
  0x29   :  { %v74_v14 = vand.u32 4294901760, %v49_v10  ;;  %v77_v15 = vand.u32 4294901760, %v50_v11  ;;  %v52_v17 = vld [vmem:[#allocation5 + $0x38] sm:$0xff]  ;;  %v80_v19 = vand.u32 4294901760, %v51_v16  ;;  %v53_v21 = vld [vmem:[#allocation5 + $0x40] sm:$0xff]  ;;  %v54_v23 = vld [vmem:[#allocation5 + $0x48] sm:$0xff]  ;;  %v2500_v34 = vsub.f32 %v45_v2, %v62_v5 }
  0x2a   :  { %v2478_v12 = vpack.c.bf16 %v65_v6, %v62_v5  ;;  %v2481_v13 = vpack.c.bf16 %v71_v9, %v68_v8  ;;  %v83_v20 = vand.u32 4294901760, %v52_v17  ;;  %v2489_v22 = vld [vmem:[#allocation2] sm:$0xf]  ;;  %v55_v24 = vld [vmem:[#allocation5 + $0x50] sm:$0xff]  ;;  %v57_v26 = vld [vmem:[#allocation5 + $0x60] sm:$0xff]  ;;  %v86_v27 = vand.u32 4294901760, %v53_v21 }
  0x2b   :  { %v2487_v18 = vpack.c.bf16 %v77_v15, %v74_v14  ;;  %v56_v25 = vld [vmem:[#allocation5 + $0x58] sm:$0xff]  ;;  %v58_v28 = vld [vmem:[#allocation5 + $0x68] sm:$0xff]  ;;  %v59_v29 = vld [vmem:[#allocation5 + $0x70] sm:$0xff]  ;;  %v2495_v31 = vand.u32 4294901760, %v2489_v22  ;;  %v89_v33 = vand.u32 4294901760, %v54_v23  ;;  %v2502_v35 = vsub.f32 %v46_v3, %v65_v6  ;;  %s1380_s18 = sshll.u32 %s2415_s17, 4  ;;  %s1381_s18 = int_to_ptr.vmem [resolvable:$true] %s1380_s18 }
  0x2c   :  { %2018 = vmatpush3.bf16.msra.mxu0 %v2478_v12  ;;  %2162 = vmatpush3.bf16.msra.mxu1 %v2478_v12  ;;  %v60_v30 = vld [vmem:[#allocation5 + $0x78] sm:$0xff]  ;;  %v2498_v32 = vpack.c.bf16 %v83_v20, %v80_v19  ;;  %v92_v36 = vand.u32 4294901760, %v55_v24  ;;  %v95_v37 = vand.u32 4294901760, %v56_v25  ;;  %v98_v38 = vand.u32 4294901760, %v57_v26  ;;  %s2380_s19 = scalar_lea.vmem %s1381_s18, 64  ;;  %p2385_p3 = scmp.lt.s32.totalorder %s1381_s18, %s1381_s18 }
  0x2d   :  { %2019 = vmatprep.subr.bf16.mxu0 %v2412_v0  ;;  %2163 = vmatprep.subr.bf16.mxu1 %v2412_v0  ;;  %v101_v39 = vand.u32 4294901760, %v58_v28  ;;  %v104_v40 = vand.u32 4294901760, %v59_v29  ;;  %v107_v41 = vand.u32 4294901760, %v60_v30  ;;  %v2509_v42 = vsub.f32 %v2489_v22, %v2495_v31  ;;  %p2381_p2 = scmp.ne.s32.totalorder %s1381_s18, %s2380_s19  ;;  %p2386_p4 = scmp.lt.s32.totalorder %s2380_s19, %s2380_s19 }
  0x2e   :  { %v2511_v43 = vsub.f32 %v47_v4, %v68_v8  ;;  %v2514_v44 = vpack.c.bf16 %v89_v33, %v86_v27  ;;  %v155_v45 = vand.u32 4294901760, %v2500_v34  ;;  %v162_v46 = vand.u32 4294901760, %v2502_v35 }
  0x2f   :  { %v2518_v47 = vsub.f32 %v48_v7, %v71_v9  ;;  %v2522_v48 = vsub.f32 %v49_v10, %v74_v14  ;;  %v2525_v49 = vpack.c.bf16 %v95_v37, %v92_v36  ;;  %v2527_v50 = vpack.c.bf16 %v101_v39, %v98_v38  ;;  %p2387_p5 = por %p2386_p4, %p2385_p3 }
  0x30   :  { %2021 = vmatpush3.bf16.msra.mxu0 %v2481_v13  ;;  %2165 = vmatpush3.bf16.msra.mxu1 %v2481_v13  ;;  %v2529_v51 = vpack.c.bf16 %v107_v41, %v104_v40  ;;  %v144_v52 = vand.u32 4294901760, %v2509_v42  ;;  %v169_v53 = vand.u32 4294901760, %v2511_v43  ;;  %v2533_v54 = vsub.f32 %v50_v11, %v77_v15 }
  0x31   :  { %2022 = vmatprep.subr.bf16.mxu0 %v2412_v0  ;;  %2166 = vmatprep.subr.bf16.mxu1 %v2412_v0  ;;  %v2535_v55 = vsub.f32 %v51_v16, %v80_v19  ;;  %v156_v56 = vsub.f32 %v2500_v34, %v155_v45  ;;  %v163_v57 = vsub.f32 %v2502_v35, %v162_v46  ;;  %v176_v58 = vand.u32 4294901760, %v2518_v47  ;;  %p2388_p6 = pnand %p2387_p5, %p2381_p2 }
  0x32   :  { %v2541_v59 = vsub.f32 %v52_v17, %v83_v20  ;;  %v183_v60 = vand.u32 4294901760, %v2522_v48  ;;  %v2546_v61 = vsub.f32 %v53_v21, %v86_v27  ;;  %v2548_v62 = vsub.f32 %v54_v23, %v89_v33 }
  0x33   :  { %v2550_v63 = vsub.f32 %v55_v24, %v92_v36  ;;  %v2553_v2 = vsub.f32 %v56_v25, %v95_v37  ;;  %v2555_v3 = vsub.f32 %v57_v26, %v98_v38  ;;  %v2557_v4 = vsub.f32 %v58_v28, %v101_v39 }
  0x34   :  { %2024 = vmatpush3.bf16.msra.mxu0 %v2487_v18  ;;  %2168 = vmatpush3.bf16.msra.mxu1 %v2487_v18  ;;  %v2559_v5 = vsub.f32 %v59_v29, %v104_v40  ;;  %v145_v6 = vsub.f32 %v2509_v42, %v144_v52  ;;  %v170_v7 = vsub.f32 %v2511_v43, %v169_v53  ;;  %v190_v8 = vand.u32 4294901760, %v2533_v54 }
  0x35   :  { %2025 = vmatprep.subr.bf16.mxu0 %v2412_v0  ;;  %2169 = vmatprep.subr.bf16.mxu1 %v2412_v0  ;;  %v2566_v9 = vsub.f32 %v60_v30, %v107_v41  ;;  %v157_v10 = vand.u32 4294901760, %v156_v56  ;;  %v164_v11 = vand.u32 4294901760, %v163_v57  ;;  %v177_v14 = vsub.f32 %v2518_v47, %v176_v58 }
  0x36   :  { %v197_v15 = vand.u32 4294901760, %v2535_v55  ;;  %v204_v16 = vand.u32 4294901760, %v2541_v59  ;;  %v211_v17 = vand.u32 4294901760, %v2546_v61  ;;  %v218_v19 = vand.u32 4294901760, %v2548_v62 }
  0x37   :  { %v225_v20 = vand.u32 4294901760, %v2550_v63  ;;  %v232_v21 = vand.u32 4294901760, %v2553_v2  ;;  %v239_v23 = vand.u32 4294901760, %v2555_v3  ;;  %v246_v24 = vand.u32 4294901760, %v2557_v4 }
  0x38   :  { %2027 = vmatpush3.bf16.msra.mxu0 %v2498_v32  ;;  %2171 = vmatpush3.bf16.msra.mxu1 %v2498_v32  ;;  %v253_v25 = vand.u32 4294901760, %v2559_v5  ;;  %v260_v26 = vand.u32 4294901760, %v2566_v9  ;;  %v2583_v27 = vpack.c.bf16 %v162_v46, %v155_v45  ;;  %v2585_v28 = vpack.c.bf16 %v176_v58, %v169_v53 }
  0x39   :  { %2028 = vmatprep.subr.bf16.mxu0 %v2412_v0  ;;  %2172 = vmatprep.subr.bf16.mxu1 %v2412_v0  ;;  %v2587_v29 = vpack.c.bf16 %v190_v8, %v183_v60  ;;  %v2590_v30 = vpack.c.bf16 %v204_v16, %v197_v15  ;;  %v2592_v33 = vpack.c.bf16 %v218_v19, %v211_v17  ;;  %v146_v39 = vand.u32 4294901760, %v145_v6 }
  0x3a   :  { %v2594_v36 = vpack.c.bf16 %v232_v21, %v225_v20  ;;  %v2596_v37 = vpack.c.bf16 %v246_v24, %v239_v23  ;;  %v2599_v38 = vpack.c.bf16 %v260_v26, %v253_v25  ;;  %v184_v40 = vsub.f32 %v2522_v48, %v183_v60 }
  0x3b   :  { %v2605_v41 = vpack.c.bf16 %v164_v11, %v157_v10  ;;  %v171_v45 = vand.u32 4294901760, %v170_v7  ;;  %v178_v46 = vand.u32 4294901760, %v177_v14  ;;  %v191_v53 = vsub.f32 %v2533_v54, %v190_v8 }
  0x3c   :  { %2030 = vmatpush3.bf16.msra.mxu0 %v2514_v44  ;;  %2174 = vmatpush3.bf16.msra.mxu1 %v2514_v44  ;;  %v198_v56 = vsub.f32 %v2535_v55, %v197_v15  ;;  %v185_v58 = vand.u32 4294901760, %v184_v40  ;;  %v205_v6 = vsub.f32 %v2541_v59, %v204_v16  ;;  %v212_v11 = vsub.f32 %v2546_v61, %v211_v17 }
  0x3d   :  { %2031 = vmatprep.subr.bf16.mxu0 %v2412_v0  ;;  %2175 = vmatprep.subr.bf16.mxu1 %v2412_v0  ;;  %v2613_v57 = vpack.c.bf16 %v178_v46, %v171_v45  ;;  %v192_v60 = vand.u32 4294901760, %v191_v53  ;;  %v219_v14 = vsub.f32 %v2548_v62, %v218_v19  ;;  %v226_v15 = vsub.f32 %v2550_v63, %v225_v20 }
  0x3e   :  { %v199_v7 = vand.u32 4294901760, %v198_v56  ;;  %v206_v10 = vand.u32 4294901760, %v205_v6  ;;  %v233_v45 = vsub.f32 %v2553_v2, %v232_v21  ;;  %v240_v46 = vsub.f32 %v2555_v3, %v239_v23 }
  0x3f   :  { %v2620_v8 = vpack.c.bf16 %v192_v60, %v185_v58  ;;  %v220_v40 = vand.u32 4294901760, %v219_v14  ;;  %v227_v19 = vand.u32 4294901760, %v226_v15  ;;  %v247_v20 = vsub.f32 %v2557_v4, %v246_v24 }
  0x40   :  { %2033 = vmatpush3.bf16.msra.mxu0 %v2525_v49  ;;  %2177 = vmatpush3.bf16.msra.mxu1 %v2525_v49  ;;  %v2627_v16 = vpack.c.bf16 %v206_v10, %v199_v7  ;;  %v234_v53 = vand.u32 4294901760, %v233_v45  ;;  %v254_v56 = vsub.f32 %v2559_v5, %v253_v25  ;;  %v241_v21 = vand.u32 4294901760, %v240_v46 }
  0x41   :  { %2034 = vmatprep.subr.bf16.mxu0 %v2412_v0  ;;  %2178 = vmatprep.subr.bf16.mxu1 %v2412_v0  ;;  %v248_v60 = vand.u32 4294901760, %v247_v20  ;;  %v261_v23 = vsub.f32 %v2566_v9, %v260_v26  ;;  %v2654_v26 = vpack.c.bf16 %v2502_v35, %v2500_v34  ;;  %v2661_v10 = vpack.c.bf16 %v2518_v47, %v2511_v43 }
  0x42   :  { %v2639_v58 = vpack.c.bf16 %v234_v53, %v227_v19  ;;  %v255_v7 = vand.u32 4294901760, %v254_v56  ;;  %v2669_v34 = vpack.c.bf16 %v2533_v54, %v2522_v48  ;;  %v2675_v35 = vpack.c.bf16 %v2541_v59, %v2535_v55 }
  0x43   :  { %v2644_v6 = vpack.c.bf16 %v248_v60, %v241_v21  ;;  %v262_v24 = vand.u32 4294901760, %v261_v23  ;;  %v2681_v43 = vpack.c.bf16 %v2548_v62, %v2546_v61  ;;  %v2687_v47 = vpack.c.bf16 %v2553_v2, %v2550_v63 }
  0x44   :  { %2036 = vmatpush3.bf16.msra.mxu0 %v2527_v50  ;;  %2180 = vmatpush3.bf16.msra.mxu1 %v2527_v50  ;;  %v2693_v48 = vpack.c.bf16 %v2557_v4, %v2555_v3  ;;  %v2699_v54 = vpack.c.bf16 %v2566_v9, %v2559_v5  ;;  %v1391_v5 = vld [vmem:[%s2883_s2] ss:$0 sm:$0xff] }
  0x45   :  { %2037 = vmatprep.subr.bf16.mxu0 %v2412_v0  ;;  %2181 = vmatprep.subr.bf16.mxu1 %v2412_v0  ;;  %v2648_v25 = vpack.c.bf16 %v262_v24, %v255_v7 }
  0x48   :  { %2039 = vmatpush3.bf16.msra.mxu0 %v2529_v51  ;;  %2183 = vmatpush3.bf16.msra.mxu1 %v2529_v51 }
  0x49   :  { %2040 = vmatprep.subr.bf16.mxu0 %v2412_v0  ;;  %2184 = vmatprep.subr.bf16.mxu1 %v2412_v0 }
  0x4b   :  { %1629 = vmatmul.mubr.f32.vlgmr.msra.gmra.mrb[0].mxu0 %v146_v39  ;;  %v213_v39 = vand.u32 4294901760, %v212_v11 }
  0x4c   :  { %2042 = vmatpush3.bf16.msra.mxu0 %v2605_v41  ;;  %1663 = vmatprep.mubr.msk.f32.mxu0 %vm2413_vm0, %v2414_v1 }
  0x4d   :  { %2043 = vmatprep.subr.bf16.mxu0 %v2412_v0  ;;  %v2633_v17 = vpack.c.bf16 %v220_v40, %v213_v39 }
  0x50   :  { %2045 = vmatpush3.bf16.msra.mxu0 %v2613_v57 }
  0x51   :  { %2046 = vmatprep.subr.bf16.mxu0 %v2412_v0 }
  0x54   :  { %2048 = vmatpush3.bf16.msra.mxu0 %v2620_v8 }
  0x55   :  { %2049 = vmatprep.subr.bf16.mxu0 %v2412_v0 }
  0x58   :  { %2051 = vmatpush3.bf16.msra.mxu0 %v2627_v16 }
  0x59   :  { %2052 = vmatprep.subr.bf16.mxu0 %v2412_v0 }
  0x5c   :  { %2054 = vmatpush3.bf16.msra.mxu0 %v2633_v17 }
  0x5d   :  { %2055 = vmatprep.subr.bf16.mxu0 %v2412_v0 }
  0x60   :  { %2057 = vmatpush3.bf16.msra.mxu0 %v2639_v58 }
  0x61   :  { %2058 = vmatprep.subr.bf16.mxu0 %v2412_v0 }
  0x64   :  { %2060 = vmatpush3.bf16.msra.mxu0 %v2644_v6 }
  0x65   :  { %2061 = vmatprep.subr.bf16.mxu0 %v2412_v0 }
  0x68   :  { %2063 = vmatpush3.bf16.msra.mxu0 %v2648_v25 }
  0x69   :  { %2064 = vmatprep.subr.bf16.mxu0 %v2412_v0 }
  0x6b   :  { %1664 = vmatmul.mubr.f32.vlgmr.msra.gmra.mrb[0].mxu0 %v2495_v31 }
  0x6c   :  { %2066 = vmatpush3.bf16.msra.mxu0 %v2654_v26  ;;  %1698 = vmatprep.mubr.msk.f32.mxu0 %vm2413_vm0, %v2414_v1 }
  0x6d   :  { %2067 = vmatprep.subr.bf16.mxu0 %v2412_v0 }
  0x70   :  { %2069 = vmatpush3.bf16.msra.mxu0 %v2661_v10 }
  0x71   :  { %2070 = vmatprep.subr.bf16.mxu0 %v2412_v0 }
  0x74   :  { %2072 = vmatpush3.bf16.msra.mxu0 %v2669_v34 }
  0x75   :  { %2073 = vmatprep.subr.bf16.mxu0 %v2412_v0 }
  0x78   :  { %2075 = vmatpush3.bf16.msra.mxu0 %v2675_v35 }
  0x79   :  { %2076 = vmatprep.subr.bf16.mxu0 %v2412_v0 }
  0x7c   :  { %2078 = vmatpush3.bf16.msra.mxu0 %v2681_v43 }
  0x7d   :  { %2079 = vmatprep.subr.bf16.mxu0 %v2412_v0 }
  0x80   :  { %2081 = vmatpush3.bf16.msra.mxu0 %v2687_v47 }
  0x81   :  { %2082 = vmatprep.subr.bf16.mxu0 %v2412_v0 }
  0x84   :  { %2084 = vmatpush3.bf16.msra.mxu0 %v2693_v48 }
  0x85   :  { %2085 = vmatprep.subr.bf16.mxu0 %v2412_v0 }
  0x88   :  { %2087 = vmatpush3.bf16.msra.mxu0 %v2699_v54 }
  0x89   :  { %2088 = vmatprep.subr.bf16.mxu0 %v2412_v0 }
  0x8b   :  { %1699 = vmatmul.mubr.f32.vlgmr.msra.gmra.mrb[0].mxu0 %v2509_v42 }
  0x8c   :  { %2090 = vmatpush3.bf16.msra.mxu0 %v2478_v12  ;;  %1733 = vmatprep.mubr.msk.f32.mxu0 %vm2413_vm0, %v2414_v1 }
  0x8d   :  { %2091 = vmatprep.subr.bf16.mxu0 %v2412_v0 }
  0x90   :  { %2093 = vmatpush3.bf16.msra.mxu0 %v2481_v13 }
  0x91   :  { %2094 = vmatprep.subr.bf16.mxu0 %v2412_v0 }
  0x94   :  { %2096 = vmatpush3.bf16.msra.mxu0 %v2487_v18 }
  0x95   :  { %2097 = vmatprep.subr.bf16.mxu0 %v2412_v0 }
  0x98   :  { %2099 = vmatpush3.bf16.msra.mxu0 %v2498_v32 }
  0x99   :  { %2100 = vmatprep.subr.bf16.mxu0 %v2412_v0 }
  0x9c   :  { %2102 = vmatpush3.bf16.msra.mxu0 %v2514_v44 }
  0x9d   :  { %2103 = vmatprep.subr.bf16.mxu0 %v2412_v0 }
  0xa0   :  { %2105 = vmatpush3.bf16.msra.mxu0 %v2525_v49 }
  0xa1   :  { %2106 = vmatprep.subr.bf16.mxu0 %v2412_v0 }
  0xa4   :  { %2108 = vmatpush3.bf16.msra.mxu0 %v2527_v50 }
  0xa5   :  { %2109 = vmatprep.subr.bf16.mxu0 %v2412_v0 }
  0xa8   :  { %2111 = vmatpush3.bf16.msra.mxu0 %v2529_v51 }
  0xa9   :  { %2112 = vmatprep.subr.bf16.mxu0 %v2412_v0 }
  0xab   :  { %1734 = vmatmul.mubr.f32.vlgmr.msra.gmra.mrb[0].mxu0 %v144_v52 }
  0xac   :  { %2114 = vmatpush3.bf16.msra.mxu0 %v2583_v27  ;;  %1768 = vmatprep.mubr.msk.f32.mxu0 %vm2413_vm0, %v2414_v1 }
  0xad   :  { %2115 = vmatprep.subr.bf16.mxu0 %v2412_v0 }
  0xb0   :  { %2117 = vmatpush3.bf16.msra.mxu0 %v2585_v28 }
  0xb1   :  { %2118 = vmatprep.subr.bf16.mxu0 %v2412_v0 }
  0xb4   :  { %2120 = vmatpush3.bf16.msra.mxu0 %v2587_v29 }
  0xb5   :  { %2121 = vmatprep.subr.bf16.mxu0 %v2412_v0 }
  0xb8   :  { %2123 = vmatpush3.bf16.msra.mxu0 %v2590_v30 }
  0xb9   :  { %2124 = vmatprep.subr.bf16.mxu0 %v2412_v0 }
  0xbc   :  { %2126 = vmatpush3.bf16.msra.mxu0 %v2592_v33 }
  0xbd   :  { %2127 = vmatprep.subr.bf16.mxu0 %v2412_v0 }
  0xc0   :  { %2129 = vmatpush3.bf16.msra.mxu0 %v2594_v36 }
  0xc1   :  { %2130 = vmatprep.subr.bf16.mxu0 %v2412_v0 }
  0xc4   :  { %2132 = vmatpush3.bf16.msra.mxu0 %v2596_v37 }
  0xc5   :  { %2133 = vmatprep.subr.bf16.mxu0 %v2412_v0 }
  0xc8   :  { %2135 = vmatpush3.bf16.msra.mxu0 %v2599_v38 }
  0xc9   :  { %2136 = vmatprep.subr.bf16.mxu0 %v2412_v0 }
  0xcb   :  { %1769 = vmatmul.mubr.f32.vlgmr.msra.gmra.mrb[0].mxu0 %v2495_v31 }
  0xcc   :  { %2138 = vmatpush3.bf16.msra.mxu0 %v2478_v12  ;;  %1803 = vmatprep.mubr.msk.f32.mxu0 %vm2413_vm0, %v2414_v1 }
  0xcd   :  { %2139 = vmatprep.subr.bf16.mxu0 %v2412_v0 }
  0xd0   :  { %2141 = vmatpush3.bf16.msra.mxu0 %v2481_v13 }
  0xd1   :  { %2142 = vmatprep.subr.bf16.mxu0 %v2412_v0 }
  0xd4   :  { %2144 = vmatpush3.bf16.msra.mxu0 %v2487_v18 }
  0xd5   :  { %2145 = vmatprep.subr.bf16.mxu0 %v2412_v0 }
  0xd8   :  { %2147 = vmatpush3.bf16.msra.mxu0 %v2498_v32 }
  0xd9   :  { %2148 = vmatprep.subr.bf16.mxu0 %v2412_v0 }
  0xdc   :  { %2150 = vmatpush3.bf16.msra.mxu0 %v2514_v44 }
  0xdd   :  { %2151 = vmatprep.subr.bf16.mxu0 %v2412_v0 }
  0xe0   :  { %2153 = vmatpush3.bf16.msra.mxu0 %v2525_v49 }
  0xe1   :  { %2154 = vmatprep.subr.bf16.mxu0 %v2412_v0 }
  0xe4   :  { %2156 = vmatpush3.bf16.msra.mxu0 %v2527_v50 }
  0xe5   :  { %2157 = vmatprep.subr.bf16.mxu0 %v2412_v0 }
  0xe8   :  { %2159 = vmatpush3.bf16.msra.mxu0 %v2529_v51 }
  0xeb   :  { %1804 = vmatmul.mubr.f32.vlgmr.msra.gmra.mrb[0].mxu0 %v2495_v31 }
 0x1be   :  { %v698_v42 = vpop.f32.mrb[0].mxu0 }
 0x1bf   :  { %v702_v52 = vmul.f32 0.03125, %v698_v42  ;;  %v1805_v55 = vpop.f32.mrb[1].mxu0 }
 0x1c1   :  { %v2763_v59 = vsub.f32 %v2489_v22, %v702_v52 }
 0x1c3   :  { %v704_v61 = vmul.f32 %v2763_v59, %v2763_v59 }
 0x1c5   :  { %v2767_v62 = vand.u32 4294901760, %v704_v61 }
 0x1c7   :  { %v787_v63 = vsub.f32 %v704_v61, %v2767_v62 }
 0x1c9   :  { %v788_v2 = vand.u32 4294901760, %v787_v63 }
 0x1cb   :  { %v789_v3 = vsub.f32 %v787_v63, %v788_v2 }
 0x1cd   :  { %v790_v4 = vand.u32 4294901760, %v789_v3 }
 0x1cf   :  { %1839 = vmatmul.mubr.f32.vlgmr.msra.gmra.mrb[0].mxu1 %v790_v4 }
 0x1d0   :  { %2186 = vmatpush3.bf16.msra.mxu1 %v2605_v41  ;;  %1873 = vmatprep.mubr.msk.f32.mxu1 %vm2413_vm0, %v2414_v1 }
 0x1d1   :  { %2187 = vmatprep.subr.bf16.mxu1 %v2412_v0 }
 0x1d4   :  { %2189 = vmatpush3.bf16.msra.mxu1 %v2613_v57 }
 0x1d5   :  { %2190 = vmatprep.subr.bf16.mxu1 %v2412_v0 }
 0x1d8   :  { %2192 = vmatpush3.bf16.msra.mxu1 %v2620_v8 }
 0x1d9   :  { %2193 = vmatprep.subr.bf16.mxu1 %v2412_v0 }
 0x1dc   :  { %2195 = vmatpush3.bf16.msra.mxu1 %v2627_v16 }
 0x1dd   :  { %2196 = vmatprep.subr.bf16.mxu1 %v2412_v0 }
 0x1e0   :  { %2198 = vmatpush3.bf16.msra.mxu1 %v2633_v17 }
 0x1e1   :  { %2199 = vmatprep.subr.bf16.mxu1 %v2412_v0 }
 0x1e4   :  { %2201 = vmatpush3.bf16.msra.mxu1 %v2639_v58 }
 0x1e5   :  { %2202 = vmatprep.subr.bf16.mxu1 %v2412_v0 }
 0x1e8   :  { %2204 = vmatpush3.bf16.msra.mxu1 %v2644_v6 }
 0x1e9   :  { %2205 = vmatprep.subr.bf16.mxu1 %v2412_v0 }
 0x1ec   :  { %2207 = vmatpush3.bf16.msra.mxu1 %v2648_v25 }
 0x1ed   :  { %2208 = vmatprep.subr.bf16.mxu1 %v2412_v0 }
 0x1ef   :  { %1874 = vmatmul.mubr.f32.vlgmr.msra.gmra.mrb[0].mxu1 %v2767_v62 }
 0x1f0   :  { %2210 = vmatpush3.bf16.msra.mxu1 %v2654_v26  ;;  %1908 = vmatprep.mubr.msk.f32.mxu1 %vm2413_vm0, %v2414_v1 }
 0x1f1   :  { %2211 = vmatprep.subr.bf16.mxu1 %v2412_v0 }
 0x1f4   :  { %2213 = vmatpush3.bf16.msra.mxu1 %v2661_v10 }
 0x1f5   :  { %2214 = vmatprep.subr.bf16.mxu1 %v2412_v0 }
 0x1f8   :  { %2216 = vmatpush3.bf16.msra.mxu1 %v2669_v34 }
 0x1f9   :  { %2217 = vmatprep.subr.bf16.mxu1 %v2412_v0 }
 0x1fc   :  { %2219 = vmatpush3.bf16.msra.mxu1 %v2675_v35 }
 0x1fd   :  { %2220 = vmatprep.subr.bf16.mxu1 %v2412_v0 }
 0x200   :  { %2222 = vmatpush3.bf16.msra.mxu1 %v2681_v43 }
 0x201   :  { %2223 = vmatprep.subr.bf16.mxu1 %v2412_v0 }
 0x204   :  { %2225 = vmatpush3.bf16.msra.mxu1 %v2687_v47 }
 0x205   :  { %2226 = vmatprep.subr.bf16.mxu1 %v2412_v0 }
 0x208   :  { %2228 = vmatpush3.bf16.msra.mxu1 %v2693_v48 }
 0x209   :  { %2229 = vmatprep.subr.bf16.mxu1 %v2412_v0 }
 0x20c   :  { %2231 = vmatpush3.bf16.msra.mxu1 %v2699_v54 }
 0x20d   :  { %2232 = vmatprep.subr.bf16.mxu1 %v2412_v0 }
 0x20f   :  { %1909 = vmatmul.mubr.f32.vlgmr.msra.gmra.mrb[0].mxu1 %v787_v63 }
 0x210   :  { %2234 = vmatpush3.bf16.msra.mxu1 %v2478_v12  ;;  %1943 = vmatprep.mubr.msk.f32.mxu1 %vm2413_vm0, %v2414_v1 }
 0x211   :  { %2235 = vmatprep.subr.bf16.mxu1 %v2412_v0 }
 0x214   :  { %2237 = vmatpush3.bf16.msra.mxu1 %v2481_v13 }
 0x215   :  { %2238 = vmatprep.subr.bf16.mxu1 %v2412_v0 }
 0x218   :  { %2240 = vmatpush3.bf16.msra.mxu1 %v2487_v18 }
 0x219   :  { %2241 = vmatprep.subr.bf16.mxu1 %v2412_v0 }
 0x21c   :  { %2243 = vmatpush3.bf16.msra.mxu1 %v2498_v32 }
 0x21d   :  { %2244 = vmatprep.subr.bf16.mxu1 %v2412_v0 }
 0x220   :  { %2246 = vmatpush3.bf16.msra.mxu1 %v2514_v44 }
 0x221   :  { %2247 = vmatprep.subr.bf16.mxu1 %v2412_v0 }
 0x224   :  { %2249 = vmatpush3.bf16.msra.mxu1 %v2525_v49 }
 0x225   :  { %2250 = vmatprep.subr.bf16.mxu1 %v2412_v0 }
 0x228   :  { %2252 = vmatpush3.bf16.msra.mxu1 %v2527_v50 }
 0x229   :  { %2253 = vmatprep.subr.bf16.mxu1 %v2412_v0 }
 0x22c   :  { %2255 = vmatpush3.bf16.msra.mxu1 %v2529_v51 }
 0x22d   :  { %2256 = vmatprep.subr.bf16.mxu1 %v2412_v0 }
 0x22f   :  { %1944 = vmatmul.mubr.f32.vlgmr.msra.gmra.mrb[0].mxu1 %v788_v2 }
 0x230   :  { %2258 = vmatpush3.bf16.msra.mxu1 %v2583_v27  ;;  %1978 = vmatprep.mubr.msk.f32.mxu1 %vm2413_vm0, %v2414_v1 }
 0x231   :  { %2259 = vmatprep.subr.bf16.mxu1 %v2412_v0 }
 0x234   :  { %2261 = vmatpush3.bf16.msra.mxu1 %v2585_v28 }
 0x235   :  { %2262 = vmatprep.subr.bf16.mxu1 %v2412_v0 }
 0x238   :  { %2264 = vmatpush3.bf16.msra.mxu1 %v2587_v29 }
 0x239   :  { %2265 = vmatprep.subr.bf16.mxu1 %v2412_v0 }
 0x23c   :  { %2267 = vmatpush3.bf16.msra.mxu1 %v2590_v30 }
 0x23d   :  { %2268 = vmatprep.subr.bf16.mxu1 %v2412_v0 }
 0x240   :  { %2270 = vmatpush3.bf16.msra.mxu1 %v2592_v33 }
 0x241   :  { %2271 = vmatprep.subr.bf16.mxu1 %v2412_v0 }
 0x244   :  { %2273 = vmatpush3.bf16.msra.mxu1 %v2594_v36 }
 0x245   :  { %2274 = vmatprep.subr.bf16.mxu1 %v2412_v0 }
 0x248   :  { %2276 = vmatpush3.bf16.msra.mxu1 %v2596_v37 }
 0x249   :  { %2277 = vmatprep.subr.bf16.mxu1 %v2412_v0 }
 0x24c   :  { %2279 = vmatpush3.bf16.msra.mxu1 %v2599_v38 }
 0x24d   :  { %2280 = vmatprep.subr.bf16.mxu1 %v2412_v0 }
 0x24f   :  { %1979 = vmatmul.mubr.f32.vlgmr.msra.gmra.mrb[0].mxu1 %v2767_v62 }
 0x250   :  { %2282 = vmatpush3.bf16.msra.mxu1 %v2478_v12  ;;  %2013 = vmatprep.mubr.msk.f32.mxu1 %vm2413_vm0, %v2414_v1 }
 0x251   :  { %2283 = vmatprep.subr.bf16.mxu1 %v2412_v0 }
 0x254   :  { %2285 = vmatpush3.bf16.msra.mxu1 %v2481_v13 }
 0x255   :  { %2286 = vmatprep.subr.bf16.mxu1 %v2412_v0 }
 0x258   :  { %2288 = vmatpush3.bf16.msra.mxu1 %v2487_v18 }
 0x259   :  { %2289 = vmatprep.subr.bf16.mxu1 %v2412_v0 }
 0x25c   :  { %2291 = vmatpush3.bf16.msra.mxu1 %v2498_v32 }
 0x25d   :  { %2292 = vmatprep.subr.bf16.mxu1 %v2412_v0 }
 0x260   :  { %2294 = vmatpush3.bf16.msra.mxu1 %v2514_v44 }
 0x261   :  { %2295 = vmatprep.subr.bf16.mxu1 %v2412_v0 }
 0x264   :  { %2297 = vmatpush3.bf16.msra.mxu1 %v2525_v49 }
 0x265   :  { %2298 = vmatprep.subr.bf16.mxu1 %v2412_v0 }
 0x268   :  { %2300 = vmatpush3.bf16.msra.mxu1 %v2527_v50 }
 0x269   :  { %2301 = vmatprep.subr.bf16.mxu1 %v2412_v0  ;;  %v1390_v0 = vld [vmem:[%s2882_s1] ss:$0 sm:$0xff] }
 0x26c   :  { %2303 = vmatpush3.bf16.msra.mxu1 %v2529_v51 }
 0x26f   :  { %2014 = vmatmul.mubr.f32.vlgmr.msra.gmra.mrb[0].mxu1 %v2767_v62 }
 0x342   :  { %v1342_v1 = vpop.f32.mrb[0].mxu1 }
 0x343   :  { %v1346_v12 = vmul.f32 0.032258064, %v1342_v1  ;;  %v2015_v13 = vpop.f32.mrb[1].mxu1 }
 0x345   :  { %2332 = vrsqrt.f32 %v1346_v12  ;;  %vm1349_vm1 = vcmp.eq.f32.partialorder %v1346_v12, inf  ;;  %v1352_v31 = vand.u32 2147483648, %v1346_v12  ;;  %vm1351_vm2 = vcmp.eq.f32.partialorder %v1346_v12, 0.0 }
 0x34f   :  { %v2333_v18 = vpop.eup %2332 }
 0x350   :  { %v1348_v22 = vmul.f32 %v2333_v18, %v1346_v12 }
 0x352   :  { %v1350_v32 = vsel %vm1349_vm1, %v1346_v12, %v1348_v22 }
 0x353   :  { %v1353_v44 = vsel %vm1351_vm2, %v1352_v31, %v1350_v32 }
 0x354   :  { %v1354_v49 = vadd.f32 0.001, %v1353_v44 }
 0x356   :  { %2334 = vrcp.f32 %v1354_v49 }
 0x360   :  { %v2335_v50 = vpop.eup %2334 }
 0x361   :  { %v1356_v51 = vmul.f32 %v2335_v50, %v2763_v59 }
 0x363   :  { %v1364_v9 = vmul.f32 %v1390_v0, %v1356_v51 }
 0x365   :  { %v1372_v27 = vadd.f32 %v1391_v5, %v1364_v9 }
 0x367   :  { %1373 = vst [vmem:[#allocation7] sm:$0xf] %v1372_v27 }
 0x368   :  { %2391 = shalt.err (!%p2388_p6)
}
 0x369   :  { %s2392_s21 = scalar_lea.hbm %s2885_s4, 64 }
 0x36a   :  { %p2393_p7 = scmp.ne.s32.totalorder %s2885_s4, %s2392_s21  ;;  %p2396_p8 = scmp.lt.u32.totalorder %s2392_s21, %s2885_s4 }
 0x36c   :  { %p2398_p9 = pnand %p2396_p8, %p2393_p7 }
 0x36e   :  { %2401 = shalt.err (!%p2398_p9)
}
 0x36f   :  { %1383 = dma.vmem_to_hbm [thread:$0]  %s1381_s18, 64, %s2885_s4, [#allocation4]  }
 0x370   :  { %2406 = dma.done.wait [#allocation4], 64  }
 0x371   :  { %2407 = vsyncadd [#allocation4], 4294967232 }
 0x372   :  { %1387 = vsyncpa [#allocation3], 1 }
 0x373   :  { %1388 = vsyncpa [#allocation6], 1 }
 0x374   :  { %1389 = vsyncpa [#allocation4], 1 }

</bundles_post_ra>
